<compile_context>
chip_gen: v6e
topology: v6e:2x2x1
jax: 0.10.0
libtpu: 0.0.40
codegen_flags: <defaults>
</compile_context>

<pallas_src>
import functools

import jax
import jax.numpy as jnp
from jax import lax
from jax.experimental import pallas as pl
from jax.experimental.pallas import tpu as pltpu


def _lstm_chunk_kernel(gx_ref, whh_hbm_ref, h_out_ref, whh_vmem, h_sc, c_sc, *,
                       chunk, hidden, unroll):
    """One grid step = (one batch tile, one chunk of `chunk` timesteps).

    gx_ref:      (chunk, TB, 4H)  -- precomputed x @ W_ih^T + (b_ih + b_hh),
                                     stored in bf16 (use_bf16) or f32
    whh_hbm_ref: (H, 4H) in HBM   -- recurrent weight, copied once to VMEM
    h_out_ref:   (chunk, TB, H)   -- per-step hidden states (kernel output)
    whh_vmem:    (H, 4H) scratch  -- single resident copy of W_hh^T
    h_sc:        (TB, H) scratch  -- h state (bf16 on the bf16 path)
    c_sc:        (TB, H) f32 scratch -- c state (always f32)
    """
    t_chunk = pl.program_id(1)

    @pl.when(t_chunk == 0)
    def _():
        # Single resident copy of W_hh^T (no pipelined double-buffering) and
        # h0 = c0 = 0 at the start of each batch tile's time loop.
        pltpu.sync_copy(whh_hbm_ref, whh_vmem)
        h_sc[...] = jnp.zeros_like(h_sc)
        c_sc[...] = jnp.zeros_like(c_sc)

    H = hidden
    whh = whh_vmem[...]                      # (H, 4H), hoisted out of the loop

    def step(s, carry):
        h_prev, c_prev = carry               # (TB, H): h in mm dtype, c in f32
        # Recurrent matmul on the MXU (f32 accumulation); bias already folded
        # into gx in the wrapper, so no per-step bias add / broadcast here.
        gates = (gx_ref[s].astype(jnp.float32)
                 + jnp.dot(h_prev, whh, preferred_element_type=jnp.float32))
        # PyTorch gate order: input, forget, cell(g), output.
        # sigmoid(x) = 0.5*tanh(0.5*x) + 0.5  -> one EUP op per element.
        # The contiguous i/f pair is activated with a single slice/tanh.
        # NOTE: for production sizes keep H a multiple of 128 so these gate
        # slices land on lane-tile boundaries (free vreg selects).
        if_g = 0.5 * jnp.tanh(0.5 * gates[:, 0:2 * H]) + 0.5
        i_g = if_g[:, :H]
        f_g = if_g[:, H:]
        g_g = jnp.tanh(gates[:, 2 * H:3 * H])
        o_g = 0.5 * jnp.tanh(0.5 * gates[:, 3 * H:4 * H]) + 0.5
        c_t = f_g * c_prev + i_g * g_g
        h_t = (o_g * jnp.tanh(c_t)).astype(h_out_ref.dtype)  # single cast; feeds MXU+store
        h_out_ref[s] = h_t
        return h_t, c_t

    # Partial unroll keeps LLO visibility without blowing vreg live ranges.
    h_last, c_last = lax.fori_loop(
        0, chunk, step, (h_sc[...], c_sc[...]), unroll=unroll)
    h_sc[...] = h_last
    c_sc[...] = c_last


def rnn_for_qa(x, params, *, use_bf16=True, tc_max=32, tb=None):
    """x: (B, T, input_dim) float32 (batch_first, like PyTorch).
    Returns (start_logits, end_logits), each (B, T, output_dim) float32."""
    B, T, D = x.shape
    w_ih = params["w_ih"]        # (4H, D)
    w_hh = params["w_hh"]        # (4H, H)
    b_ih = params["b_ih"]        # (4H,)
    b_hh = params["b_hh"]        # (4H,)
    w_start = params["w_start"]  # (O, H)
    b_start = params["b_start"]  # (O,)
    w_end = params["w_end"]      # (O, H)
    b_end = params["b_end"]      # (O,)

    H = w_hh.shape[1]
    O = w_start.shape[0]
    mm_dtype = jnp.bfloat16 if use_bf16 else jnp.float32

    # ----- Hoisted, non-recurrent compute #1: input projection (big matmul)
    # with the folded gate bias fused into its epilogue.  Stored in mm_dtype
    # so the dominant HBM stream into the kernel is bf16 on the fast path.
    x_tm = jnp.transpose(x, (1, 0, 2))                            # (T, B, D)
    wih_t = jnp.transpose(w_ih).astype(mm_dtype)                  # (D, 4H)
    b_gate = (b_ih + b_hh).reshape(1, 1, 4 * H).astype(jnp.float32)
    gates_x = (jnp.einsum("tbd,dg->tbg", x_tm.astype(mm_dtype), wih_t,
                          preferred_element_type=jnp.float32)
               + b_gate).astype(mm_dtype)                         # (T, B, 4H)

    # Recurrent weight for the Pallas kernel (stays in HBM; single VMEM copy
    # is made inside the kernel).
    whh_t = jnp.transpose(w_hh).astype(mm_dtype)                  # (H, 4H)

    # ----- Time chunking with tail padding: never collapse to tc=1 for an
    # awkward T -- pad T up to a multiple of the chunk instead.
    tc = min(tc_max, T)
    n_chunks = pl.cdiv(T, tc)
    T_pad = n_chunks * tc
    if T_pad != T:
        gates_x = jnp.pad(gates_x, ((0, T_pad - T), (0, 0), (0, 0)))

    # Batch tiling: single tile on v5e/v6e (1 TC).  On v7x pass tb=B//2 to use
    # both TensorCores once the elementwise cell work (~TB*H) dominates.
    if tb is None:
        tb = B
    assert B % tb == 0
    grid = (B // tb, n_chunks)
    # NOTE: keep the unrolled live set (gates TB*4H f32 + gate/state vregs)
    # well under the 64x4KiB vreg file; split B into more tiles if needed.
    unroll = min(tc, 8)

    w_bytes = 2 if use_bf16 else 4
    # Explicit VMEM budget: double-buffered gx chunk + double-buffered h_out
    # chunk + resident W_hh + state scratch, with 2x headroom.
    chunk_vmem = (2 * tc * tb * 4 * H * w_bytes      # gates_x chunk (dbl-buf)
                  + 2 * tc * tb * H * w_bytes        # h_out chunk (dbl-buf)
                  + H * 4 * H * w_bytes              # resident W_hh^T (single copy)
                  + tb * H * (w_bytes + 4))          # h/c scratch
    vmem_limit = int(min(64 * 1024 * 1024, max(2 * chunk_vmem, 8 * 1024 * 1024)))

    cost = pl.CostEstimate(
        flops=2 * T_pad * B * H * 4 * H + 12 * T_pad * B * 4 * H,
        transcendentals=5 * T_pad * B * H,
        bytes_accessed=(T_pad * B * 4 * H * w_bytes     # gates_x stream
                        + H * 4 * H * w_bytes           # W_hh^T
                        + T_pad * B * H * w_bytes),     # hidden-state output
    )

    kernel = functools.partial(_lstm_chunk_kernel, chunk=tc, hidden=H,
                               unroll=unroll)

    grid_spec = pltpu.PrefetchScalarGridSpec(
        num_scalar_prefetch=0,
        grid=grid,
        in_specs=[
            pl.BlockSpec((tc, tb, 4 * H), lambda bi, ti: (ti, bi, 0)),  # gates_x chunk
            pl.BlockSpec(memory_space=pl.ANY),                          # W_hh^T (HBM)
        ],
        out_specs=pl.BlockSpec((tc, tb, H), lambda bi, ti: (ti, bi, 0)),  # h_t chunk
        scratch_shapes=[
            pltpu.VMEM((H, 4 * H), mm_dtype),   # resident W_hh^T (single copy)
            pltpu.VMEM((tb, H), mm_dtype),      # h state (bf16 on fast path)
            pltpu.VMEM((tb, H), jnp.float32),   # c state (always f32)
        ],
    )

    h_seq = pl.pallas_call(
        kernel,
        out_shape=jax.ShapeDtypeStruct((T_pad, B, H), mm_dtype),
        grid_spec=grid_spec,
        compiler_params=pltpu.CompilerParams(
            # batch tiles independent (megacore on v7x); time is sequential.
            dimension_semantics=("parallel", "arbitrary"),
            vmem_limit_bytes=vmem_limit,
        ),
        cost_estimate=cost,
    )(gates_x, whh_t)

    # ----- Hoisted, non-recurrent compute #2: fused heads as one matmul.
    # TODO(synk): optionally fuse this per-chunk inside the kernel (with 2O
    # padded to 128 lanes) to skip materializing h_seq in HBM.
    w_heads = jnp.concatenate(
        [jnp.transpose(w_start), jnp.transpose(w_end)], axis=1).astype(mm_dtype)  # (H, 2O)
    b_heads = jnp.concatenate([b_start, b_end]).reshape(1, 2 * O).astype(jnp.float32)
    h_flat = h_seq[:T].reshape(T * B, H)
    logits = (jnp.dot(h_flat.astype(mm_dtype), w_heads,
                      preferred_element_type=jnp.float32)
              + b_heads).reshape(T, B, 2 * O)

    start_tm = logits[:, :, :O]
    end_tm = logits[:, :, O:]
    # Back to batch_first (B, T, O).
    return jnp.transpose(start_tm, (1, 0, 2)), jnp.transpose(end_tm, (1, 0, 2))


def init_params(key, input_dim, hidden_dim, output_dim):
    """Deterministic parameter init mirroring nn.LSTM / nn.Linear shapes."""
    ks = jax.random.split(key, 8)
    k_lstm = 1.0 / jnp.sqrt(hidden_dim)
    u = lambda k, shape, bound: jax.random.uniform(
        k, shape, jnp.float32, -bound, bound)
    return {
        "w_ih": u(ks[0], (4 * hidden_dim, input_dim), k_lstm),
        "w_hh": u(ks[1], (4 * hidden_dim, hidden_dim), k_lstm),
        "b_ih": u(ks[2], (4 * hidden_dim,), k_lstm),
        "b_hh": u(ks[3], (4 * hidden_dim,), k_lstm),
        "w_start": u(ks[4], (output_dim, hidden_dim), 1.0 / jnp.sqrt(hidden_dim)),
        "b_start": u(ks[5], (output_dim,), 1.0 / jnp.sqrt(hidden_dim)),
        "w_end": u(ks[6], (output_dim, hidden_dim), 1.0 / jnp.sqrt(hidden_dim)),
        "b_end": u(ks[7], (output_dim,), 1.0 / jnp.sqrt(hidden_dim)),
    }


def _reference(x, params):
    """Pure-JAX f32 reference of the PyTorch forward."""
    B, T, D = x.shape
    H = params["w_hh"].shape[1]
    wih_t = params["w_ih"].T
    whh_t = params["w_hh"].T
    b = params["b_ih"] + params["b_hh"]

    def step(carry, x_t):
        h, c = carry
        gates = x_t @ wih_t + h @ whh_t + b
        i = jax.nn.sigmoid(gates[:, 0 * H:1 * H])
        f = jax.nn.sigmoid(gates[:, 1 * H:2 * H])
        g = jnp.tanh(gates[:, 2 * H:3 * H])
        o = jax.nn.sigmoid(gates[:, 3 * H:4 * H])
        c = f * c + i * g
        h = o * jnp.tanh(c)
        return (h, c), h

    h0 = jnp.zeros((B, H), jnp.float32)
    c0 = jnp.zeros((B, H), jnp.float32)
    _, hs = jax.lax.scan(step, (h0, c0), jnp.transpose(x, (1, 0, 2)))
    hs = jnp.transpose(hs, (1, 0, 2))  # (B, T, H)
    start = hs @ params["w_start"].T + params["b_start"]
    end = hs @ params["w_end"].T + params["b_end"]
    return start, end


if __name__ == "__main__":
    B, T, input_dim, hidden_dim, output_dim = 2, 8, 16, 32, 8

    key = jax.random.PRNGKey(0)
    kx, kp = jax.random.split(key)
    x = jax.random.normal(kx, (B, T, input_dim), jnp.float32)
    params = init_params(kp, input_dim, hidden_dim, output_dim)

    ref_start, ref_end = _reference(x, params)

    # f32 path: tight numerical check against the reference.
    s32, e32 = jax.jit(functools.partial(rnn_for_qa, use_bf16=False))(x, params)
    jax.block_until_ready((s32, e32))
    assert s32.shape == (B, T, output_dim) and e32.shape == (B, T, output_dim)
    assert jnp.allclose(s32, ref_start, atol=5e-4, rtol=5e-4)
    assert jnp.allclose(e32, ref_end, atol=5e-4, rtol=5e-4)

    # bf16 fast path (bf16 gates_x / h stream + MXU operands, f32 accumulation
    # and f32 cell state) -- loose sanity tolerance.
    sbf, ebf = jax.jit(functools.partial(rnn_for_qa, use_bf16=True))(x, params)
    jax.block_until_ready((sbf, ebf))
    assert jnp.allclose(sbf, ref_start, atol=1e-1, rtol=1e-1)
    assert jnp.allclose(ebf, ref_end, atol=1e-1, rtol=1e-1)

    print("KERNEL_OK")
</pallas_src>

<mosaic_0001>
module attributes {stable_mosaic.version = 11 : i64} {
  func.func @_lstm_chunk_kernel(%arg0: i32, %arg1: i32, %arg2: memref<8x2x128xf32, #tpu.memory_space<vmem>>, %arg3: memref<32x128xf32, #tpu.memory_space<any>>, %arg4: memref<8x2x32xf32, #tpu.memory_space<vmem>>, %arg5: memref<32x128xf32, #tpu.memory_space<vmem>>, %arg6: memref<2x32xf32, #tpu.memory_space<vmem>>, %arg7: memref<2x32xf32, #tpu.memory_space<vmem>>) attributes {dimension_semantics = [#tpu.dimension_semantics<parallel>, #tpu.dimension_semantics<arbitrary>], iteration_bounds = array<i64: 1, 1>, scalar_prefetch = 0 : i64, scratch_operands = 3 : i64, tpu.core_type = #tpu.core_type<tc>, window_params = [{transform_indices = @transform_0, window_bounds = array<i64: 8, 2, 128>}, {}, {transform_indices = @transform_2, window_bounds = array<i64: 8, 2, 32>}]} {
    %c0_i32 = arith.constant 0 : i32
    %0 = arith.cmpi eq, %arg1, %c0_i32 : i32
    %1 = arith.extui %0 : i1 to i32
    %c0_i32_0 = arith.constant 0 : i32
    %2 = arith.cmpi ne, %1, %c0_i32_0 : i32
    scf.if %2 {
      "tpu.region"() ({
        %284 = tpu.sem_alloc : memref<!tpu.dma_semaphore, #tpu.memory_space<semaphore_mem>>
        tpu.enqueue_dma source(%arg3 : memref<32x128xf32, #tpu.memory_space<any>>) target(%arg5 : memref<32x128xf32, #tpu.memory_space<vmem>>) target_semaphore(%284 : memref<!tpu.dma_semaphore, #tpu.memory_space<semaphore_mem>>)
        tpu.wait_dma2 semaphore(%284 : memref<!tpu.dma_semaphore, #tpu.memory_space<semaphore_mem>>) src(%arg3 : memref<32x128xf32, #tpu.memory_space<any>>) dst(%arg5 : memref<32x128xf32, #tpu.memory_space<vmem>>)
        tpu.yield
      }) : () -> ()
      %cst_98 = arith.constant 0.000000e+00 : f32
      %280 = vector.broadcast %cst_98 : f32 to vector<2x32xf32>
      %c0_99 = arith.constant 0 : index
      %c0_100 = arith.constant 0 : index
      %281 = vector.load %arg6[%c0_99, %c0_100] : memref<2x32xf32, #tpu.memory_space<vmem>>, vector<2x32xf32>
      tpu.vector_store %arg6[%c0_99, %c0_100], %280 {strides = array<i32>} : memref<2x32xf32, #tpu.memory_space<vmem>>, vector<2x32xf32>,
      %cst_101 = arith.constant 0.000000e+00 : f32
      %282 = vector.broadcast %cst_101 : f32 to vector<2x32xf32>
      %c0_102 = arith.constant 0 : index
      %c0_103 = arith.constant 0 : index
      %283 = vector.load %arg7[%c0_102, %c0_103] : memref<2x32xf32, #tpu.memory_space<vmem>>, vector<2x32xf32>
      tpu.vector_store %arg7[%c0_102, %c0_103], %282 {strides = array<i32>} : memref<2x32xf32, #tpu.memory_space<vmem>>, vector<2x32xf32>,
    } else {
    }
    %c0 = arith.constant 0 : index
    %c0_1 = arith.constant 0 : index
    %3 = vector.load %arg5[%c0, %c0_1] : memref<32x128xf32, #tpu.memory_space<vmem>>, vector<32x128xf32>
    %c0_2 = arith.constant 0 : index
    %c0_3 = arith.constant 0 : index
    %4 = vector.load %arg6[%c0_2, %c0_3] : memref<2x32xf32, #tpu.memory_space<vmem>>, vector<2x32xf32>
    %c0_4 = arith.constant 0 : index
    %c0_5 = arith.constant 0 : index
    %5 = vector.load %arg7[%c0_4, %c0_5] : memref<2x32xf32, #tpu.memory_space<vmem>>, vector<2x32xf32>
    %c0_i32_6 = arith.constant 0 : i32
    %6 = arith.index_cast %c0_i32_6 : i32 to index
    %c0_7 = arith.constant 0 : index
    %c0_8 = arith.constant 0 : index
    %7 = vector.load %arg2[%6, %c0_7, %c0_8] : memref<8x2x128xf32, #tpu.memory_space<vmem>>, vector<1x2x128xf32>
    %8 = vector.shape_cast %7 : vector<1x2x128xf32> to vector<2x128xf32>
    %cst = arith.constant dense<0.000000e+00> : vector<2x128xf32>
    %9 = tpu.matmul %4, %3, %cst {dimension_numbers = #tpu.dot_dimension_numbers<[1], [0], [0], [1], [0, 0, 1, 1], [], []>} : vector<2x32xf32>, vector<32x128xf32>, vector<2x128xf32> -> vector<2x128xf32>
    %10 = arith.addf %8, %9 : vector<2x128xf32>
    %11 = vector.extract_strided_slice %10 {offsets = [0, 0], sizes = [2, 64], strides = [1, 1]} : vector<2x128xf32> to vector<2x64xf32>
    %cst_9 = arith.constant 5.000000e-01 : f32
    %12 = vector.broadcast %cst_9 : f32 to vector<2x64xf32>
    %13 = arith.mulf %12, %11 : vector<2x64xf32>
    %14 = math.tanh %13 : vector<2x64xf32>
    %cst_10 = arith.constant 5.000000e-01 : f32
    %15 = vector.broadcast %cst_10 : f32 to vector<2x64xf32>
    %16 = arith.mulf %15, %14 : vector<2x64xf32>
    %cst_11 = arith.constant 5.000000e-01 : f32
    %17 = vector.broadcast %cst_11 : f32 to vector<2x64xf32>
    %18 = arith.addf %16, %17 : vector<2x64xf32>
    %19 = vector.extract_strided_slice %18 {offsets = [0, 0], sizes = [2, 32], strides = [1, 1]} : vector<2x64xf32> to vector<2x32xf32>
    %20 = vector.extract_strided_slice %18 {offsets = [0, 32], sizes = [2, 32], strides = [1, 1]} : vector<2x64xf32> to vector<2x32xf32>
    %21 = vector.extract_strided_slice %10 {offsets = [0, 64], sizes = [2, 32], strides = [1, 1]} : vector<2x128xf32> to vector<2x32xf32>
    %22 = math.tanh %21 : vector<2x32xf32>
    %23 = vector.extract_strided_slice %10 {offsets = [0, 96], sizes = [2, 32], strides = [1, 1]} : vector<2x128xf32> to vector<2x32xf32>
    %cst_12 = arith.constant 5.000000e-01 : f32
    %24 = vector.broadcast %cst_12 : f32 to vector<2x32xf32>
    %25 = arith.mulf %24, %23 : vector<2x32xf32>
    %26 = math.tanh %25 : vector<2x32xf32>
    %cst_13 = arith.constant 5.000000e-01 : f32
    %27 = vector.broadcast %cst_13 : f32 to vector<2x32xf32>
    %28 = arith.mulf %27, %26 : vector<2x32xf32>
    %cst_14 = arith.constant 5.000000e-01 : f32
    %29 = vector.broadcast %cst_14 : f32 to vector<2x32xf32>
    %30 = arith.addf %28, %29 : vector<2x32xf32>
    %31 = arith.mulf %20, %5 : vector<2x32xf32>
    %32 = arith.mulf %19, %22 : vector<2x32xf32>
    %33 = arith.addf %31, %32 : vector<2x32xf32>
    %34 = math.tanh %33 : vector<2x32xf32>
    %35 = arith.mulf %30, %34 : vector<2x32xf32>
    %36 = arith.index_cast %c0_i32_6 : i32 to index
    %c0_15 = arith.constant 0 : index
    %c0_16 = arith.constant 0 : index
    %37 = vector.load %arg4[%36, %c0_15, %c0_16] : memref<8x2x32xf32, #tpu.memory_space<vmem>>, vector<1x2x32xf32>
    %38 = vector.shape_cast %37 : vector<1x2x32xf32> to vector<2x32xf32>
    %39 = vector.shape_cast %35 : vector<2x32xf32> to vector<1x2x32xf32>
    tpu.vector_store %arg4[%36, %c0_15, %c0_16], %39 {strides = array<i32>} : memref<8x2x32xf32, #tpu.memory_space<vmem>>, vector<1x2x32xf32>,
    %c1_i32 = arith.constant 1 : i32
    %40 = arith.index_cast %c1_i32 : i32 to index
    %c0_17 = arith.constant 0 : index
    %c0_18 = arith.constant 0 : index
    %41 = vector.load %arg2[%40, %c0_17, %c0_18] : memref<8x2x128xf32, #tpu.memory_space<vmem>>, vector<1x2x128xf32>
    %42 = vector.shape_cast %41 : vector<1x2x128xf32> to vector<2x128xf32>
    %cst_19 = arith.constant dense<0.000000e+00> : vector<2x128xf32>
    %43 = tpu.matmul %35, %3, %cst_19 {dimension_numbers = #tpu.dot_dimension_numbers<[1], [0], [0], [1], [0, 0, 1, 1], [], []>} : vector<2x32xf32>, vector<32x128xf32>, vector<2x128xf32> -> vector<2x128xf32>
    %44 = arith.addf %42, %43 : vector<2x128xf32>
    %45 = vector.extract_strided_slice %44 {offsets = [0, 0], sizes = [2, 64], strides = [1, 1]} : vector<2x128xf32> to vector<2x64xf32>
    %cst_20 = arith.constant 5.000000e-01 : f32
    %46 = vector.broadcast %cst_20 : f32 to vector<2x64xf32>
    %47 = arith.mulf %46, %45 : vector<2x64xf32>
    %48 = math.tanh %47 : vector<2x64xf32>
    %cst_21 = arith.constant 5.000000e-01 : f32
    %49 = vector.broadcast %cst_21 : f32 to vector<2x64xf32>
    %50 = arith.mulf %49, %48 : vector<2x64xf32>
    %cst_22 = arith.constant 5.000000e-01 : f32
    %51 = vector.broadcast %cst_22 : f32 to vector<2x64xf32>
    %52 = arith.addf %50, %51 : vector<2x64xf32>
    %53 = vector.extract_strided_slice %52 {offsets = [0, 0], sizes = [2, 32], strides = [1, 1]} : vector<2x64xf32> to vector<2x32xf32>
    %54 = vector.extract_strided_slice %52 {offsets = [0, 32], sizes = [2, 32], strides = [1, 1]} : vector<2x64xf32> to vector<2x32xf32>
    %55 = vector.extract_strided_slice %44 {offsets = [0, 64], sizes = [2, 32], strides = [1, 1]} : vector<2x128xf32> to vector<2x32xf32>
    %56 = math.tanh %55 : vector<2x32xf32>
    %57 = vector.extract_strided_slice %44 {offsets = [0, 96], sizes = [2, 32], strides = [1, 1]} : vector<2x128xf32> to vector<2x32xf32>
    %cst_23 = arith.constant 5.000000e-01 : f32
    %58 = vector.broadcast %cst_23 : f32 to vector<2x32xf32>
    %59 = arith.mulf %58, %57 : vector<2x32xf32>
    %60 = math.tanh %59 : vector<2x32xf32>
    %cst_24 = arith.constant 5.000000e-01 : f32
    %61 = vector.broadcast %cst_24 : f32 to vector<2x32xf32>
    %62 = arith.mulf %61, %60 : vector<2x32xf32>
    %cst_25 = arith.constant 5.000000e-01 : f32
    %63 = vector.broadcast %cst_25 : f32 to vector<2x32xf32>
    %64 = arith.addf %62, %63 : vector<2x32xf32>
    %65 = arith.mulf %54, %33 : vector<2x32xf32>
    %66 = arith.mulf %53, %56 : vector<2x32xf32>
    %67 = arith.addf %65, %66 : vector<2x32xf32>
    %68 = math.tanh %67 : vector<2x32xf32>
    %69 = arith.mulf %64, %68 : vector<2x32xf32>
    %70 = arith.index_cast %c1_i32 : i32 to index
    %c0_26 = arith.constant 0 : index
    %c0_27 = arith.constant 0 : index
    %71 = vector.load %arg4[%70, %c0_26, %c0_27] : memref<8x2x32xf32, #tpu.memory_space<vmem>>, vector<1x2x32xf32>
    %72 = vector.shape_cast %71 : vector<1x2x32xf32> to vector<2x32xf32>
    %73 = vector.shape_cast %69 : vector<2x32xf32> to vector<1x2x32xf32>
    tpu.vector_store %arg4[%70, %c0_26, %c0_27], %73 {strides = array<i32>} : memref<8x2x32xf32, #tpu.memory_space<vmem>>, vector<1x2x32xf32>,
    %c2_i32 = arith.constant 2 : i32
    %74 = arith.index_cast %c2_i32 : i32 to index
    %c0_28 = arith.constant 0 : index
    %c0_29 = arith.constant 0 : index
    %75 = vector.load %arg2[%74, %c0_28, %c0_29] : memref<8x2x128xf32, #tpu.memory_space<vmem>>, vector<1x2x128xf32>
    %76 = vector.shape_cast %75 : vector<1x2x128xf32> to vector<2x128xf32>
    %cst_30 = arith.constant dense<0.000000e+00> : vector<2x128xf32>
    %77 = tpu.matmul %69, %3, %cst_30 {dimension_numbers = #tpu.dot_dimension_numbers<[1], [0], [0], [1], [0, 0, 1, 1], [], []>} : vector<2x32xf32>, vector<32x128xf32>, vector<2x128xf32> -> vector<2x128xf32>
    %78 = arith.addf %76, %77 : vector<2x128xf32>
    %79 = vector.extract_strided_slice %78 {offsets = [0, 0], sizes = [2, 64], strides = [1, 1]} : vector<2x128xf32> to vector<2x64xf32>
    %cst_31 = arith.constant 5.000000e-01 : f32
    %80 = vector.broadcast %cst_31 : f32 to vector<2x64xf32>
    %81 = arith.mulf %80, %79 : vector<2x64xf32>
    %82 = math.tanh %81 : vector<2x64xf32>
    %cst_32 = arith.constant 5.000000e-01 : f32
    %83 = vector.broadcast %cst_32 : f32 to vector<2x64xf32>
    %84 = arith.mulf %83, %82 : vector<2x64xf32>
    %cst_33 = arith.constant 5.000000e-01 : f32
    %85 = vector.broadcast %cst_33 : f32 to vector<2x64xf32>
    %86 = arith.addf %84, %85 : vector<2x64xf32>
    %87 = vector.extract_strided_slice %86 {offsets = [0, 0], sizes = [2, 32], strides = [1, 1]} : vector<2x64xf32> to vector<2x32xf32>
    %88 = vector.extract_strided_slice %86 {offsets = [0, 32], sizes = [2, 32], strides = [1, 1]} : vector<2x64xf32> to vector<2x32xf32>
    %89 = vector.extract_strided_slice %78 {offsets = [0, 64], sizes = [2, 32], strides = [1, 1]} : vector<2x128xf32> to vector<2x32xf32>
    %90 = math.tanh %89 : vector<2x32xf32>
    %91 = vector.extract_strided_slice %78 {offsets = [0, 96], sizes = [2, 32], strides = [1, 1]} : vector<2x128xf32> to vector<2x32xf32>
    %cst_34 = arith.constant 5.000000e-01 : f32
    %92 = vector.broadcast %cst_34 : f32 to vector<2x32xf32>
    %93 = arith.mulf %92, %91 : vector<2x32xf32>
    %94 = math.tanh %93 : vector<2x32xf32>
    %cst_35 = arith.constant 5.000000e-01 : f32
    %95 = vector.broadcast %cst_35 : f32 to vector<2x32xf32>
    %96 = arith.mulf %95, %94 : vector<2x32xf32>
    %cst_36 = arith.constant 5.000000e-01 : f32
    %97 = vector.broadcast %cst_36 : f32 to vector<2x32xf32>
    %98 = arith.addf %96, %97 : vector<2x32xf32>
    %99 = arith.mulf %88, %67 : vector<2x32xf32>
    %100 = arith.mulf %87, %90 : vector<2x32xf32>
    %101 = arith.addf %99, %100 : vector<2x32xf32>
    %102 = math.tanh %101 : vector<2x32xf32>
    %103 = arith.mulf %98, %102 : vector<2x32xf32>
    %104 = arith.index_cast %c2_i32 : i32 to index
    %c0_37 = arith.constant 0 : index
    %c0_38 = arith.constant 0 : index
    %105 = vector.load %arg4[%104, %c0_37, %c0_38] : memref<8x2x32xf32, #tpu.memory_space<vmem>>, vector<1x2x32xf32>
    %106 = vector.shape_cast %105 : vector<1x2x32xf32> to vector<2x32xf32>
    %107 = vector.shape_cast %103 : vector<2x32xf32> to vector<1x2x32xf32>
    tpu.vector_store %arg4[%104, %c0_37, %c0_38], %107 {strides = array<i32>} : memref<8x2x32xf32, #tpu.memory_space<vmem>>, vector<1x2x32xf32>,
    %c3_i32 = arith.constant 3 : i32
    %108 = arith.index_cast %c3_i32 : i32 to index
    %c0_39 = arith.constant 0 : index
    %c0_40 = arith.constant 0 : index
    %109 = vector.load %arg2[%108, %c0_39, %c0_40] : memref<8x2x128xf32, #tpu.memory_space<vmem>>, vector<1x2x128xf32>
    %110 = vector.shape_cast %109 : vector<1x2x128xf32> to vector<2x128xf32>
    %cst_41 = arith.constant dense<0.000000e+00> : vector<2x128xf32>
    %111 = tpu.matmul %103, %3, %cst_41 {dimension_numbers = #tpu.dot_dimension_numbers<[1], [0], [0], [1], [0, 0, 1, 1], [], []>} : vector<2x32xf32>, vector<32x128xf32>, vector<2x128xf32> -> vector<2x128xf32>
    %112 = arith.addf %110, %111 : vector<2x128xf32>
    %113 = vector.extract_strided_slice %112 {offsets = [0, 0], sizes = [2, 64], strides = [1, 1]} : vector<2x128xf32> to vector<2x64xf32>
    %cst_42 = arith.constant 5.000000e-01 : f32
    %114 = vector.broadcast %cst_42 : f32 to vector<2x64xf32>
    %115 = arith.mulf %114, %113 : vector<2x64xf32>
    %116 = math.tanh %115 : vector<2x64xf32>
    %cst_43 = arith.constant 5.000000e-01 : f32
    %117 = vector.broadcast %cst_43 : f32 to vector<2x64xf32>
    %118 = arith.mulf %117, %116 : vector<2x64xf32>
    %cst_44 = arith.constant 5.000000e-01 : f32
    %119 = vector.broadcast %cst_44 : f32 to vector<2x64xf32>
    %120 = arith.addf %118, %119 : vector<2x64xf32>
    %121 = vector.extract_strided_slice %120 {offsets = [0, 0], sizes = [2, 32], strides = [1, 1]} : vector<2x64xf32> to vector<2x32xf32>
    %122 = vector.extract_strided_slice %120 {offsets = [0, 32], sizes = [2, 32], strides = [1, 1]} : vector<2x64xf32> to vector<2x32xf32>
    %123 = vector.extract_strided_slice %112 {offsets = [0, 64], sizes = [2, 32], strides = [1, 1]} : vector<2x128xf32> to vector<2x32xf32>
    %124 = math.tanh %123 : vector<2x32xf32>
    %125 = vector.extract_strided_slice %112 {offsets = [0, 96], sizes = [2, 32], strides = [1, 1]} : vector<2x128xf32> to vector<2x32xf32>
    %cst_45 = arith.constant 5.000000e-01 : f32
    %126 = vector.broadcast %cst_45 : f32 to vector<2x32xf32>
    %127 = arith.mulf %126, %125 : vector<2x32xf32>
    %128 = math.tanh %127 : vector<2x32xf32>
    %cst_46 = arith.constant 5.000000e-01 : f32
    %129 = vector.broadcast %cst_46 : f32 to vector<2x32xf32>
    %130 = arith.mulf %129, %128 : vector<2x32xf32>
    %cst_47 = arith.constant 5.000000e-01 : f32
    %131 = vector.broadcast %cst_47 : f32 to vector<2x32xf32>
    %132 = arith.addf %130, %131 : vector<2x32xf32>
    %133 = arith.mulf %122, %101 : vector<2x32xf32>
    %134 = arith.mulf %121, %124 : vector<2x32xf32>
    %135 = arith.addf %133, %134 : vector<2x32xf32>
    %136 = math.tanh %135 : vector<2x32xf32>
    %137 = arith.mulf %132, %136 : vector<2x32xf32>
    %138 = arith.index_cast %c3_i32 : i32 to index
    %c0_48 = arith.constant 0 : index
    %c0_49 = arith.constant 0 : index
    %139 = vector.load %arg4[%138, %c0_48, %c0_49] : memref<8x2x32xf32, #tpu.memory_space<vmem>>, vector<1x2x32xf32>
    %140 = vector.shape_cast %139 : vector<1x2x32xf32> to vector<2x32xf32>
    %141 = vector.shape_cast %137 : vector<2x32xf32> to vector<1x2x32xf32>
    tpu.vector_store %arg4[%138, %c0_48, %c0_49], %141 {strides = array<i32>} : memref<8x2x32xf32, #tpu.memory_space<vmem>>, vector<1x2x32xf32>,
    %c4_i32 = arith.constant 4 : i32
    %142 = arith.index_cast %c4_i32 : i32 to index
    %c0_50 = arith.constant 0 : index
    %c0_51 = arith.constant 0 : index
    %143 = vector.load %arg2[%142, %c0_50, %c0_51] : memref<8x2x128xf32, #tpu.memory_space<vmem>>, vector<1x2x128xf32>
    %144 = vector.shape_cast %143 : vector<1x2x128xf32> to vector<2x128xf32>
    %cst_52 = arith.constant dense<0.000000e+00> : vector<2x128xf32>
    %145 = tpu.matmul %137, %3, %cst_52 {dimension_numbers = #tpu.dot_dimension_numbers<[1], [0], [0], [1], [0, 0, 1, 1], [], []>} : vector<2x32xf32>, vector<32x128xf32>, vector<2x128xf32> -> vector<2x128xf32>
    %146 = arith.addf %144, %145 : vector<2x128xf32>
    %147 = vector.extract_strided_slice %146 {offsets = [0, 0], sizes = [2, 64], strides = [1, 1]} : vector<2x128xf32> to vector<2x64xf32>
    %cst_53 = arith.constant 5.000000e-01 : f32
    %148 = vector.broadcast %cst_53 : f32 to vector<2x64xf32>
    %149 = arith.mulf %148, %147 : vector<2x64xf32>
    %150 = math.tanh %149 : vector<2x64xf32>
    %cst_54 = arith.constant 5.000000e-01 : f32
    %151 = vector.broadcast %cst_54 : f32 to vector<2x64xf32>
    %152 = arith.mulf %151, %150 : vector<2x64xf32>
    %cst_55 = arith.constant 5.000000e-01 : f32
    %153 = vector.broadcast %cst_55 : f32 to vector<2x64xf32>
    %154 = arith.addf %152, %153 : vector<2x64xf32>
    %155 = vector.extract_strided_slice %154 {offsets = [0, 0], sizes = [2, 32], strides = [1, 1]} : vector<2x64xf32> to vector<2x32xf32>
    %156 = vector.extract_strided_slice %154 {offsets = [0, 32], sizes = [2, 32], strides = [1, 1]} : vector<2x64xf32> to vector<2x32xf32>
    %157 = vector.extract_strided_slice %146 {offsets = [0, 64], sizes = [2, 32], strides = [1, 1]} : vector<2x128xf32> to vector<2x32xf32>
    %158 = math.tanh %157 : vector<2x32xf32>
    %159 = vector.extract_strided_slice %146 {offsets = [0, 96], sizes = [2, 32], strides = [1, 1]} : vector<2x128xf32> to vector<2x32xf32>
    %cst_56 = arith.constant 5.000000e-01 : f32
    %160 = vector.broadcast %cst_56 : f32 to vector<2x32xf32>
    %161 = arith.mulf %160, %159 : vector<2x32xf32>
    %162 = math.tanh %161 : vector<2x32xf32>
    %cst_57 = arith.constant 5.000000e-01 : f32
    %163 = vector.broadcast %cst_57 : f32 to vector<2x32xf32>
    %164 = arith.mulf %163, %162 : vector<2x32xf32>
    %cst_58 = arith.constant 5.000000e-01 : f32
    %165 = vector.broadcast %cst_58 : f32 to vector<2x32xf32>
    %166 = arith.addf %164, %165 : vector<2x32xf32>
    %167 = arith.mulf %156, %135 : vector<2x32xf32>
    %168 = arith.mulf %155, %158 : vector<2x32xf32>
    %169 = arith.addf %167, %168 : vector<2x32xf32>
    %170 = math.tanh %169 : vector<2x32xf32>
    %171 = arith.mulf %166, %170 : vector<2x32xf32>
    %172 = arith.index_cast %c4_i32 : i32 to index
    %c0_59 = arith.constant 0 : index
    %c0_60 = arith.constant 0 : index
    %173 = vector.load %arg4[%172, %c0_59, %c0_60] : memref<8x2x32xf32, #tpu.memory_space<vmem>>, vector<1x2x32xf32>
    %174 = vector.shape_cast %173 : vector<1x2x32xf32> to vector<2x32xf32>
    %175 = vector.shape_cast %171 : vector<2x32xf32> to vector<1x2x32xf32>
    tpu.vector_store %arg4[%172, %c0_59, %c0_60], %175 {strides = array<i32>} : memref<8x2x32xf32, #tpu.memory_space<vmem>>, vector<1x2x32xf32>,
    %c5_i32 = arith.constant 5 : i32
    %176 = arith.index_cast %c5_i32 : i32 to index
    %c0_61 = arith.constant 0 : index
    %c0_62 = arith.constant 0 : index
    %177 = vector.load %arg2[%176, %c0_61, %c0_62] : memref<8x2x128xf32, #tpu.memory_space<vmem>>, vector<1x2x128xf32>
    %178 = vector.shape_cast %177 : vector<1x2x128xf32> to vector<2x128xf32>
    %cst_63 = arith.constant dense<0.000000e+00> : vector<2x128xf32>
    %179 = tpu.matmul %171, %3, %cst_63 {dimension_numbers = #tpu.dot_dimension_numbers<[1], [0], [0], [1], [0, 0, 1, 1], [], []>} : vector<2x32xf32>, vector<32x128xf32>, vector<2x128xf32> -> vector<2x128xf32>
    %180 = arith.addf %178, %179 : vector<2x128xf32>
    %181 = vector.extract_strided_slice %180 {offsets = [0, 0], sizes = [2, 64], strides = [1, 1]} : vector<2x128xf32> to vector<2x64xf32>
    %cst_64 = arith.constant 5.000000e-01 : f32
    %182 = vector.broadcast %cst_64 : f32 to vector<2x64xf32>
    %183 = arith.mulf %182, %181 : vector<2x64xf32>
    %184 = math.tanh %183 : vector<2x64xf32>
    %cst_65 = arith.constant 5.000000e-01 : f32
    %185 = vector.broadcast %cst_65 : f32 to vector<2x64xf32>
    %186 = arith.mulf %185, %184 : vector<2x64xf32>
    %cst_66 = arith.constant 5.000000e-01 : f32
    %187 = vector.broadcast %cst_66 : f32 to vector<2x64xf32>
    %188 = arith.addf %186, %187 : vector<2x64xf32>
    %189 = vector.extract_strided_slice %188 {offsets = [0, 0], sizes = [2, 32], strides = [1, 1]} : vector<2x64xf32> to vector<2x32xf32>
    %190 = vector.extract_strided_slice %188 {offsets = [0, 32], sizes = [2, 32], strides = [1, 1]} : vector<2x64xf32> to vector<2x32xf32>
    %191 = vector.extract_strided_slice %180 {offsets = [0, 64], sizes = [2, 32], strides = [1, 1]} : vector<2x128xf32> to vector<2x32xf32>
    %192 = math.tanh %191 : vector<2x32xf32>
    %193 = vector.extract_strided_slice %180 {offsets = [0, 96], sizes = [2, 32], strides = [1, 1]} : vector<2x128xf32> to vector<2x32xf32>
    %cst_67 = arith.constant 5.000000e-01 : f32
    %194 = vector.broadcast %cst_67 : f32 to vector<2x32xf32>
    %195 = arith.mulf %194, %193 : vector<2x32xf32>
    %196 = math.tanh %195 : vector<2x32xf32>
    %cst_68 = arith.constant 5.000000e-01 : f32
    %197 = vector.broadcast %cst_68 : f32 to vector<2x32xf32>
    %198 = arith.mulf %197, %196 : vector<2x32xf32>
    %cst_69 = arith.constant 5.000000e-01 : f32
    %199 = vector.broadcast %cst_69 : f32 to vector<2x32xf32>
    %200 = arith.addf %198, %199 : vector<2x32xf32>
    %201 = arith.mulf %190, %169 : vector<2x32xf32>
    %202 = arith.mulf %189, %192 : vector<2x32xf32>
    %203 = arith.addf %201, %202 : vector<2x32xf32>
    %204 = math.tanh %203 : vector<2x32xf32>
    %205 = arith.mulf %200, %204 : vector<2x32xf32>
    %206 = arith.index_cast %c5_i32 : i32 to index
    %c0_70 = arith.constant 0 : index
    %c0_71 = arith.constant 0 : index
    %207 = vector.load %arg4[%206, %c0_70, %c0_71] : memref<8x2x32xf32, #tpu.memory_space<vmem>>, vector<1x2x32xf32>
    %208 = vector.shape_cast %207 : vector<1x2x32xf32> to vector<2x32xf32>
    %209 = vector.shape_cast %205 : vector<2x32xf32> to vector<1x2x32xf32>
    tpu.vector_store %arg4[%206, %c0_70, %c0_71], %209 {strides = array<i32>} : memref<8x2x32xf32, #tpu.memory_space<vmem>>, vector<1x2x32xf32>,
    %c6_i32 = arith.constant 6 : i32
    %210 = arith.index_cast %c6_i32 : i32 to index
    %c0_72 = arith.constant 0 : index
    %c0_73 = arith.constant 0 : index
    %211 = vector.load %arg2[%210, %c0_72, %c0_73] : memref<8x2x128xf32, #tpu.memory_space<vmem>>, vector<1x2x128xf32>
    %212 = vector.shape_cast %211 : vector<1x2x128xf32> to vector<2x128xf32>
    %cst_74 = arith.constant dense<0.000000e+00> : vector<2x128xf32>
    %213 = tpu.matmul %205, %3, %cst_74 {dimension_numbers = #tpu.dot_dimension_numbers<[1], [0], [0], [1], [0, 0, 1, 1], [], []>} : vector<2x32xf32>, vector<32x128xf32>, vector<2x128xf32> -> vector<2x128xf32>
    %214 = arith.addf %212, %213 : vector<2x128xf32>
    %215 = vector.extract_strided_slice %214 {offsets = [0, 0], sizes = [2, 64], strides = [1, 1]} : vector<2x128xf32> to vector<2x64xf32>
    %cst_75 = arith.constant 5.000000e-01 : f32
    %216 = vector.broadcast %cst_75 : f32 to vector<2x64xf32>
    %217 = arith.mulf %216, %215 : vector<2x64xf32>
    %218 = math.tanh %217 : vector<2x64xf32>
    %cst_76 = arith.constant 5.000000e-01 : f32
    %219 = vector.broadcast %cst_76 : f32 to vector<2x64xf32>
    %220 = arith.mulf %219, %218 : vector<2x64xf32>
    %cst_77 = arith.constant 5.000000e-01 : f32
    %221 = vector.broadcast %cst_77 : f32 to vector<2x64xf32>
    %222 = arith.addf %220, %221 : vector<2x64xf32>
    %223 = vector.extract_strided_slice %222 {offsets = [0, 0], sizes = [2, 32], strides = [1, 1]} : vector<2x64xf32> to vector<2x32xf32>
    %224 = vector.extract_strided_slice %222 {offsets = [0, 32], sizes = [2, 32], strides = [1, 1]} : vector<2x64xf32> to vector<2x32xf32>
    %225 = vector.extract_strided_slice %214 {offsets = [0, 64], sizes = [2, 32], strides = [1, 1]} : vector<2x128xf32> to vector<2x32xf32>
    %226 = math.tanh %225 : vector<2x32xf32>
    %227 = vector.extract_strided_slice %214 {offsets = [0, 96], sizes = [2, 32], strides = [1, 1]} : vector<2x128xf32> to vector<2x32xf32>
    %cst_78 = arith.constant 5.000000e-01 : f32
    %228 = vector.broadcast %cst_78 : f32 to vector<2x32xf32>
    %229 = arith.mulf %228, %227 : vector<2x32xf32>
    %230 = math.tanh %229 : vector<2x32xf32>
    %cst_79 = arith.constant 5.000000e-01 : f32
    %231 = vector.broadcast %cst_79 : f32 to vector<2x32xf32>
    %232 = arith.mulf %231, %230 : vector<2x32xf32>
    %cst_80 = arith.constant 5.000000e-01 : f32
    %233 = vector.broadcast %cst_80 : f32 to vector<2x32xf32>
    %234 = arith.addf %232, %233 : vector<2x32xf32>
    %235 = arith.mulf %224, %203 : vector<2x32xf32>
    %236 = arith.mulf %223, %226 : vector<2x32xf32>
    %237 = arith.addf %235, %236 : vector<2x32xf32>
    %238 = math.tanh %237 : vector<2x32xf32>
    %239 = arith.mulf %234, %238 : vector<2x32xf32>
    %240 = arith.index_cast %c6_i32 : i32 to index
    %c0_81 = arith.constant 0 : index
    %c0_82 = arith.constant 0 : index
    %241 = vector.load %arg4[%240, %c0_81, %c0_82] : memref<8x2x32xf32, #tpu.memory_space<vmem>>, vector<1x2x32xf32>
    %242 = vector.shape_cast %241 : vector<1x2x32xf32> to vector<2x32xf32>
    %243 = vector.shape_cast %239 : vector<2x32xf32> to vector<1x2x32xf32>
    tpu.vector_store %arg4[%240, %c0_81, %c0_82], %243 {strides = array<i32>} : memref<8x2x32xf32, #tpu.memory_space<vmem>>, vector<1x2x32xf32>,
    %c7_i32 = arith.constant 7 : i32
    %244 = arith.index_cast %c7_i32 : i32 to index
    %c0_83 = arith.constant 0 : index
    %c0_84 = arith.constant 0 : index
    %245 = vector.load %arg2[%244, %c0_83, %c0_84] : memref<8x2x128xf32, #tpu.memory_space<vmem>>, vector<1x2x128xf32>
    %246 = vector.shape_cast %245 : vector<1x2x128xf32> to vector<2x128xf32>
    %cst_85 = arith.constant dense<0.000000e+00> : vector<2x128xf32>
    %247 = tpu.matmul %239, %3, %cst_85 {dimension_numbers = #tpu.dot_dimension_numbers<[1], [0], [0], [1], [0, 0, 1, 1], [], []>} : vector<2x32xf32>, vector<32x128xf32>, vector<2x128xf32> -> vector<2x128xf32>
    %248 = arith.addf %246, %247 : vector<2x128xf32>
    %249 = vector.extract_strided_slice %248 {offsets = [0, 0], sizes = [2, 64], strides = [1, 1]} : vector<2x128xf32> to vector<2x64xf32>
    %cst_86 = arith.constant 5.000000e-01 : f32
    %250 = vector.broadcast %cst_86 : f32 to vector<2x64xf32>
    %251 = arith.mulf %250, %249 : vector<2x64xf32>
    %252 = math.tanh %251 : vector<2x64xf32>
    %cst_87 = arith.constant 5.000000e-01 : f32
    %253 = vector.broadcast %cst_87 : f32 to vector<2x64xf32>
    %254 = arith.mulf %253, %252 : vector<2x64xf32>
    %cst_88 = arith.constant 5.000000e-01 : f32
    %255 = vector.broadcast %cst_88 : f32 to vector<2x64xf32>
    %256 = arith.addf %254, %255 : vector<2x64xf32>
    %257 = vector.extract_strided_slice %256 {offsets = [0, 0], sizes = [2, 32], strides = [1, 1]} : vector<2x64xf32> to vector<2x32xf32>
    %258 = vector.extract_strided_slice %256 {offsets = [0, 32], sizes = [2, 32], strides = [1, 1]} : vector<2x64xf32> to vector<2x32xf32>
    %259 = vector.extract_strided_slice %248 {offsets = [0, 64], sizes = [2, 32], strides = [1, 1]} : vector<2x128xf32> to vector<2x32xf32>
    %260 = math.tanh %259 : vector<2x32xf32>
    %261 = vector.extract_strided_slice %248 {offsets = [0, 96], sizes = [2, 32], strides = [1, 1]} : vector<2x128xf32> to vector<2x32xf32>
    %cst_89 = arith.constant 5.000000e-01 : f32
    %262 = vector.broadcast %cst_89 : f32 to vector<2x32xf32>
    %263 = arith.mulf %262, %261 : vector<2x32xf32>
    %264 = math.tanh %263 : vector<2x32xf32>
    %cst_90 = arith.constant 5.000000e-01 : f32
    %265 = vector.broadcast %cst_90 : f32 to vector<2x32xf32>
    %266 = arith.mulf %265, %264 : vector<2x32xf32>
    %cst_91 = arith.constant 5.000000e-01 : f32
    %267 = vector.broadcast %cst_91 : f32 to vector<2x32xf32>
    %268 = arith.addf %266, %267 : vector<2x32xf32>
    %269 = arith.mulf %258, %237 : vector<2x32xf32>
    %270 = arith.mulf %257, %260 : vector<2x32xf32>
    %271 = arith.addf %269, %270 : vector<2x32xf32>
    %272 = math.tanh %271 : vector<2x32xf32>
    %273 = arith.mulf %268, %272 : vector<2x32xf32>
    %274 = arith.index_cast %c7_i32 : i32 to index
    %c0_92 = arith.constant 0 : index
    %c0_93 = arith.constant 0 : index
    %275 = vector.load %arg4[%274, %c0_92, %c0_93] : memref<8x2x32xf32, #tpu.memory_space<vmem>>, vector<1x2x32xf32>
    %276 = vector.shape_cast %275 : vector<1x2x32xf32> to vector<2x32xf32>
    %277 = vector.shape_cast %273 : vector<2x32xf32> to vector<1x2x32xf32>
    tpu.vector_store %arg4[%274, %c0_92, %c0_93], %277 {strides = array<i32>} : memref<8x2x32xf32, #tpu.memory_space<vmem>>, vector<1x2x32xf32>,
    %c8_i32 = arith.constant 8 : i32
    %c0_94 = arith.constant 0 : index
    %c0_95 = arith.constant 0 : index
    %278 = vector.load %arg6[%c0_94, %c0_95] : memref<2x32xf32, #tpu.memory_space<vmem>>, vector<2x32xf32>
    tpu.vector_store %arg6[%c0_94, %c0_95], %273 {strides = array<i32>} : memref<2x32xf32, #tpu.memory_space<vmem>>, vector<2x32xf32>,
    %c0_96 = arith.constant 0 : index
    %c0_97 = arith.constant 0 : index
    %279 = vector.load %arg7[%c0_96, %c0_97] : memref<2x32xf32, #tpu.memory_space<vmem>>, vector<2x32xf32>
    tpu.vector_store %arg7[%c0_96, %c0_97], %271 {strides = array<i32>} : memref<2x32xf32, #tpu.memory_space<vmem>>, vector<2x32xf32>,
    return
  }
  func.func @transform_0(%arg0: i32, %arg1: i32) -> (i32, i32, i32) {
    %c0_i32 = arith.constant 0 : i32
    %c0_i32_0 = arith.constant 0 : i32
    return %arg1, %arg0, %c0_i32 : i32, i32, i32
  }
  func.func @transform_2(%arg0: i32, %arg1: i32) -> (i32, i32, i32) {
    %c0_i32 = arith.constant 0 : i32
    %c0_i32_0 = arith.constant 0 : i32
    return %arg1, %arg0, %c0_i32 : i32, i32, i32
  }
}

</mosaic_0001>

<bundles_post_ra>
// kernel: rnn_for_qa.1
= control target key start
LH: loop header
LB: loop body
LE: loop exit
PB: predicated region body
PF: predicated region fallthrough
CT: control target
= control target key end

     0   :  { %s1349_s0 = inlined_call_operand.vmem [shape: f32[8,2,128], index: 0, kind: input, shape index: {}]   ;;  %s1350_s1 = inlined_call_operand.vmem [shape: f32[32,128], index: 1, kind: input, shape index: {}]   ;;  %s1351_s2 = inlined_call_operand.vmem [shape: f32[8,2,32], index: 2, kind: output, shape index: {}]  }
   0x1   :  { %v1149_v0 = vld [vmem:[%s1350_s1] sm:$0xff]  ;;  %v1154_v1 = vld [vmem:[%s1350_s1 + $0x8] sm:$0xff]  ;;  %v1159_v2 = vld [vmem:[%s1350_s1 + $0x10] sm:$0xff] }
   0x2   :  { %v1164_v3 = vld [vmem:[%s1350_s1 + $0x18] sm:$0xff] }
   0x3   :  { %61 = vsyncadd [#allocation5], 512 }
   0x4   :  { %1124 = dma.done.wait [#allocation5], 512 }
   0x5   :  { %1125 = vsyncadd [#allocation5], 4294966784  ;;  %vm65_vm0 = vcmask 254976   ;;  %v1126_v4 = vmov 0.0   ;;  %vm1127_vm1 = vmmov 0   ;;  %vm75_vm2 = vcmask 261120  }
   0x6   :  { %983 = vmatprep.subr.mxu0 %v1126_v4  ;;  %991 = vmatprep.mubr.msk.f32.mxu0 %vm1127_vm1, %v1126_v4  ;;  %66 = vst.msk [vmem:[#allocation3] sm:$0x3] %vm65_vm0, %v1126_v4  ;;  %67 = vst.msk [vmem:[#allocation4] sm:$0x3] %vm65_vm0, %v1126_v4  ;;  %v74_v6 = vld [vmem:[%s1349_s0] sm:$0x3] }
   0x7   :  { %984 = vmatpush3.msra.mxu0 %v1164_v3  ;;  %994 = vmatprep.subr.mxu1 %v1126_v4  ;;  %s1128_s18 = smov 64   ;;  %s1129_s19 = smov 32   ;;  %v922_v26 = vld [vmem:[%s1349_s0 + $0x2] sm:$0x3]  ;;  %v925_v44 = vld [vmem:[%s1349_s0 + $0x4] sm:$0x3] }
   0x8   :  { %985 = vmatprep.subr.mxu0 %v1126_v4  ;;  %995 = vmatpush3.msra.mxu1 %v1164_v3  ;;  %v928_v62 = vld [vmem:[%s1349_s0 + $0x6] sm:$0x3] }
   0x9   :  { %986 = vmatpush3.msra.mxu0 %v1159_v2  ;;  %996 = vmatprep.subr.mxu1 %v1126_v4 }
   0xa   :  { %987 = vmatprep.subr.mxu0 %v1126_v4  ;;  %997 = vmatpush3.msra.mxu1 %v1159_v2 }
   0xb   :  { %988 = vmatpush3.msra.mxu0 %v1154_v1  ;;  %998 = vmatprep.subr.mxu1 %v1126_v4 }
   0xc   :  { %989 = vmatprep.subr.mxu0 %v1126_v4  ;;  %999 = vmatpush3.msra.mxu1 %v1154_v1 }
   0xd   :  { %990 = vmatpush3.msra.mxu0 %v1149_v0  ;;  %v72_v5 = vld [vmem:[#allocation3] sm:$0x3]  ;;  %1000 = vmatprep.subr.mxu1 %v1126_v4  ;;  %v73_v11 = vld [vmem:[#allocation4] sm:$0x3] }
   0xe   :  { %992 = vmatmul.mubr.msk.f32.vlgmr.msra.gmra.mxu0 %vm75_vm2, %v72_v5  ;;  %1001 = vmatpush3.msra.mxu1 %v1149_v0 }
   0xf   :  { %1002 = vmatprep.mubr.msk.f32.mxu1 %vm1127_vm1, %v1126_v4  ;;  %1005 = vmatprep.subr.mxu0 %v1126_v4 }
  0x10   :  { %1006 = vmatpush3.msra.mxu0 %v1164_v3  ;;  %1013 = vmatprep.mubr.msk.f32.mxu0 %vm1127_vm1, %v1126_v4 }
  0x11   :  { %1007 = vmatprep.subr.mxu0 %v1126_v4  ;;  %1016 = vmatprep.subr.mxu1 %v1126_v4 }
  0x12   :  { %1008 = vmatpush3.msra.mxu0 %v1159_v2 }
  0x13   :  { %1009 = vmatprep.subr.mxu0 %v1126_v4 }
  0x14   :  { %1010 = vmatpush3.msra.mxu0 %v1154_v1 }
  0x15   :  { %1011 = vmatprep.subr.mxu0 %v1126_v4 }
  0x16   :  { %1012 = vmatpush3.msra.mxu0 %v1149_v0 }
  0x17   :  { %1027 = vmatprep.subr.mxu0 %v1126_v4 }
  0xce   :  { %v145_v7 = vpop.f32.mrf.mxu0 }
  0xcf   :  { %v149_v8 = vadd.f32 %v145_v7, %v74_v6 }
  0xd0   :  { %v993_v9 = vpop.f32.mrf.mxu0 }
  0xd1   :  { %1076 = vtanh.f32 %v149_v8  ;;  %v150_v12 = vmul.f32 0.5, %v149_v8 }
  0xd3   :  { %1078 = vtanh.f32 %v150_v12 }
  0xde   :  { %v1077_v10 = vpop.eup %1076 }
  0xdf   :  { %161 = vrot.lane.b32.xlu0 %v1077_v10, %s1128_s18 }
  0xe0   :  { %v1079_v13 = vpop.eup %1078 }
  0xe1   :  { %v152_v14 = vmul.f32 0.5, %v1079_v13 }
  0xe3   :  { %156 = vrot.lane.b32.xlu0 %v73_v11, %s1129_s19  ;;  %v153_v15 = vadd.f32 0.5, %v152_v14 }
 0x151   :  { %v162_v16 = vpop.permute.xlu0 %161 }
 0x152   :  { %v164_v17 = vmul.f32 %v162_v16, %v153_v15 }
 0x154   :  { %166 = vrot.lane.b32.xlu1 %v164_v17, %s1129_s19 }
 0x155   :  { %v157_v18 = vpop.permute.xlu0 %156 }
 0x156   :  { %v159_v19 = vmul.f32 %v157_v18, %v153_v15 }
 0x1c6   :  { %v167_v20 = vpop.permute.xlu1 %166 }
 0x1c7   :  { %v169_v21 = vadd.f32 %v167_v20, %v159_v19 }
 0x1c9   :  { %1080 = vtanh.f32 %v169_v21 }
 0x1d6   :  { %v1081_v22 = vpop.eup %1080 }
 0x1d7   :  { %172 = vrot.lane.b32.xlu1 %v1081_v22, %s1128_s18 }
 0x249   :  { %v173_v23 = vpop.permute.xlu1 %172 }
 0x24a   :  { %v175_v24 = vmul.f32 %v173_v23, %v153_v15 }
 0x24c   :  { %177 = vrot.lane.b32.xlu0 %v175_v24, %s1129_s19 }
 0x2be   :  { %v178_v25 = vpop.permute.xlu0 %177 }
 0x2bf   :  { %181 = vst.msk [vmem:[%s1351_s2] sm:$0x3] %vm65_vm0, %v178_v25  ;;  %1003 = vmatmul.mubr.msk.f32.vlgmr.msra.gmra.mxu1 %vm75_vm2, %v178_v25 }
 0x2c0   :  { %1017 = vmatpush3.msra.mxu1 %v1164_v3  ;;  %1024 = vmatprep.mubr.msk.f32.mxu1 %vm1127_vm1, %v1126_v4 }
 0x2c1   :  { %1018 = vmatprep.subr.mxu1 %v1126_v4 }
 0x2c2   :  { %1019 = vmatpush3.msra.mxu1 %v1159_v2 }
 0x2c3   :  { %1020 = vmatprep.subr.mxu1 %v1126_v4 }
 0x2c4   :  { %1021 = vmatpush3.msra.mxu1 %v1154_v1 }
 0x2c5   :  { %1022 = vmatprep.subr.mxu1 %v1126_v4 }
 0x2c6   :  { %1023 = vmatpush3.msra.mxu1 %v1149_v0 }
 0x2c7   :  { %1038 = vmatprep.subr.mxu1 %v1126_v4 }
 0x37f   :  { %v252_v27 = vpop.f32.mrf.mxu1 }
 0x380   :  { %v256_v28 = vadd.f32 %v922_v26, %v252_v27 }
 0x381   :  { %v1004_v29 = vpop.f32.mrf.mxu1 }
 0x382   :  { %1082 = vtanh.f32 %v256_v28  ;;  %v257_v31 = vmul.f32 0.5, %v256_v28 }
 0x384   :  { %1084 = vtanh.f32 %v257_v31 }
 0x38f   :  { %v1083_v30 = vpop.eup %1082 }
 0x390   :  { %264 = vrot.lane.b32.xlu1 %v1083_v30, %s1128_s18 }
 0x391   :  { %v1085_v32 = vpop.eup %1084 }
 0x392   :  { %v259_v33 = vmul.f32 0.5, %v1085_v32 }
 0x394   :  { %v260_v34 = vadd.f32 0.5, %v259_v33 }
 0x396   :  { %v262_v37 = vmul.f32 %v260_v34, %v169_v21  ;;  %v931_v21 = vld [vmem:[%s1349_s0 + $0x8] sm:$0x3] }
 0x402   :  { %v265_v35 = vpop.permute.xlu1 %264 }
 0x403   :  { %v267_v36 = vmul.f32 %v265_v35, %v260_v34 }
 0x405   :  { %269 = vrot.lane.b32.xlu0 %v267_v36, %s1129_s19 }
 0x477   :  { %v270_v38 = vpop.permute.xlu0 %269 }
 0x478   :  { %v272_v39 = vadd.f32 %v270_v38, %v262_v37 }
 0x47a   :  { %1086 = vtanh.f32 %v272_v39 }
 0x487   :  { %v1087_v40 = vpop.eup %1086 }
 0x488   :  { %275 = vrot.lane.b32.xlu1 %v1087_v40, %s1128_s18 }
 0x4fa   :  { %v276_v41 = vpop.permute.xlu1 %275 }
 0x4fb   :  { %v278_v42 = vmul.f32 %v276_v41, %v260_v34 }
 0x4fd   :  { %280 = vrot.lane.b32.xlu0 %v278_v42, %s1129_s19 }
 0x56f   :  { %v281_v43 = vpop.permute.xlu0 %280 }
 0x570   :  { %924 = vst.msk [vmem:[%s1351_s2 + $0x2] sm:$0x3] %vm65_vm0, %v281_v43  ;;  %1014 = vmatmul.mubr.msk.f32.vlgmr.msra.gmra.mxu0 %vm75_vm2, %v281_v43 }
 0x571   :  { %1028 = vmatpush3.msra.mxu0 %v1164_v3  ;;  %1035 = vmatprep.mubr.msk.f32.mxu0 %vm1127_vm1, %v1126_v4 }
 0x572   :  { %1029 = vmatprep.subr.mxu0 %v1126_v4 }
 0x573   :  { %1030 = vmatpush3.msra.mxu0 %v1159_v2 }
 0x574   :  { %1031 = vmatprep.subr.mxu0 %v1126_v4 }
 0x575   :  { %1032 = vmatpush3.msra.mxu0 %v1154_v1 }
 0x576   :  { %1033 = vmatprep.subr.mxu0 %v1126_v4 }
 0x577   :  { %1034 = vmatpush3.msra.mxu0 %v1149_v0 }
 0x578   :  { %1049 = vmatprep.subr.mxu0 %v1126_v4 }
 0x630   :  { %v355_v45 = vpop.f32.mrf.mxu0 }
 0x631   :  { %v359_v46 = vadd.f32 %v925_v44, %v355_v45 }
 0x632   :  { %v1015_v47 = vpop.f32.mrf.mxu0 }
 0x633   :  { %1088 = vtanh.f32 %v359_v46  ;;  %v360_v49 = vmul.f32 0.5, %v359_v46 }
 0x635   :  { %1090 = vtanh.f32 %v360_v49 }
 0x640   :  { %v1089_v48 = vpop.eup %1088 }
 0x641   :  { %367 = vrot.lane.b32.xlu1 %v1089_v48, %s1128_s18 }
 0x642   :  { %v1091_v50 = vpop.eup %1090 }
 0x643   :  { %v362_v51 = vmul.f32 0.5, %v1091_v50 }
 0x645   :  { %v363_v52 = vadd.f32 0.5, %v362_v51 }
 0x647   :  { %v365_v55 = vmul.f32 %v363_v52, %v272_v39  ;;  %v934_v39 = vld [vmem:[%s1349_s0 + $0xa] sm:$0x3] }
 0x6b3   :  { %v368_v53 = vpop.permute.xlu1 %367 }
 0x6b4   :  { %v370_v54 = vmul.f32 %v368_v53, %v363_v52 }
 0x6b6   :  { %372 = vrot.lane.b32.xlu0 %v370_v54, %s1129_s19 }
 0x728   :  { %v373_v56 = vpop.permute.xlu0 %372 }
 0x729   :  { %v375_v57 = vadd.f32 %v373_v56, %v365_v55 }
 0x72b   :  { %1092 = vtanh.f32 %v375_v57 }
 0x738   :  { %v1093_v58 = vpop.eup %1092 }
 0x739   :  { %378 = vrot.lane.b32.xlu1 %v1093_v58, %s1128_s18 }
 0x7ab   :  { %v379_v59 = vpop.permute.xlu1 %378 }
 0x7ac   :  { %v381_v60 = vmul.f32 %v379_v59, %v363_v52  ;;  %v937_v52 = vld [vmem:[%s1349_s0 + $0xc] sm:$0x3] }
 0x7ae   :  { %383 = vrot.lane.b32.xlu0 %v381_v60, %s1129_s19 }
 0x820   :  { %v384_v61 = vpop.permute.xlu0 %383 }
 0x821   :  { %927 = vst.msk [vmem:[%s1351_s2 + $0x4] sm:$0x3] %vm65_vm0, %v384_v61  ;;  %1025 = vmatmul.mubr.msk.f32.vlgmr.msra.gmra.mxu1 %vm75_vm2, %v384_v61 }
 0x822   :  { %1039 = vmatpush3.msra.mxu1 %v1164_v3  ;;  %1046 = vmatprep.mubr.msk.f32.mxu1 %vm1127_vm1, %v1126_v4 }
 0x823   :  { %1040 = vmatprep.subr.mxu1 %v1126_v4 }
 0x824   :  { %1041 = vmatpush3.msra.mxu1 %v1159_v2 }
 0x825   :  { %1042 = vmatprep.subr.mxu1 %v1126_v4 }
 0x826   :  { %1043 = vmatpush3.msra.mxu1 %v1154_v1 }
 0x827   :  { %1044 = vmatprep.subr.mxu1 %v1126_v4 }
 0x828   :  { %1045 = vmatpush3.msra.mxu1 %v1149_v0 }
 0x829   :  { %1060 = vmatprep.subr.mxu1 %v1126_v4 }
 0x8e1   :  { %v458_v63 = vpop.f32.mrf.mxu1 }
 0x8e2   :  { %v462_v5 = vadd.f32 %v928_v62, %v458_v63 }
 0x8e3   :  { %v1026_v6 = vpop.f32.mrf.mxu1 }
 0x8e4   :  { %1094 = vtanh.f32 %v462_v5  ;;  %v463_v8 = vmul.f32 0.5, %v462_v5 }
 0x8e6   :  { %1096 = vtanh.f32 %v463_v8 }
 0x8f1   :  { %v1095_v7 = vpop.eup %1094 }
 0x8f2   :  { %470 = vrot.lane.b32.xlu1 %v1095_v7, %s1128_s18 }
 0x8f3   :  { %v1097_v9 = vpop.eup %1096 }
 0x8f4   :  { %v465_v10 = vmul.f32 0.5, %v1097_v9 }
 0x8f6   :  { %v466_v11 = vadd.f32 0.5, %v465_v10 }
 0x8f8   :  { %v468_v14 = vmul.f32 %v466_v11, %v375_v57 }
 0x964   :  { %v471_v12 = vpop.permute.xlu1 %470 }
 0x965   :  { %v473_v13 = vmul.f32 %v471_v12, %v466_v11 }
 0x967   :  { %475 = vrot.lane.b32.xlu0 %v473_v13, %s1129_s19 }
 0x9d9   :  { %v476_v15 = vpop.permute.xlu0 %475 }
 0x9da   :  { %v478_v16 = vadd.f32 %v476_v15, %v468_v14 }
 0x9dc   :  { %1098 = vtanh.f32 %v478_v16 }
 0x9e9   :  { %v1099_v17 = vpop.eup %1098 }
 0x9ea   :  { %481 = vrot.lane.b32.xlu1 %v1099_v17, %s1128_s18 }
 0xa5c   :  { %v482_v18 = vpop.permute.xlu1 %481 }
 0xa5d   :  { %v484_v19 = vmul.f32 %v482_v18, %v466_v11  ;;  %v940_v11 = vld [vmem:[%s1349_s0 + $0xe] sm:$0x3]  ;;  %s1130_s0 = smov 96  }
 0xa5f   :  { %486 = vrot.lane.b32.xlu0 %v484_v19, %s1129_s19 }
 0xad1   :  { %v487_v20 = vpop.permute.xlu0 %486 }
 0xad2   :  { %930 = vst.msk [vmem:[%s1351_s2 + $0x6] sm:$0x3] %vm65_vm0, %v487_v20  ;;  %1036 = vmatmul.mubr.msk.f32.vlgmr.msra.gmra.mxu0 %vm75_vm2, %v487_v20 }
 0xad3   :  { %1050 = vmatpush3.msra.mxu0 %v1164_v3  ;;  %1057 = vmatprep.mubr.msk.f32.mxu0 %vm1127_vm1, %v1126_v4 }
 0xad4   :  { %1051 = vmatprep.subr.mxu0 %v1126_v4 }
 0xad5   :  { %1052 = vmatpush3.msra.mxu0 %v1159_v2 }
 0xad6   :  { %1053 = vmatprep.subr.mxu0 %v1126_v4 }
 0xad7   :  { %1054 = vmatpush3.msra.mxu0 %v1154_v1 }
 0xad8   :  { %1055 = vmatprep.subr.mxu0 %v1126_v4 }
 0xad9   :  { %1056 = vmatpush3.msra.mxu0 %v1149_v0 }
 0xb92   :  { %v561_v22 = vpop.f32.mrf.mxu0 }
 0xb93   :  { %v565_v23 = vadd.f32 %v931_v21, %v561_v22 }
 0xb94   :  { %v1037_v24 = vpop.f32.mrf.mxu0 }
 0xb95   :  { %1100 = vtanh.f32 %v565_v23  ;;  %v566_v26 = vmul.f32 0.5, %v565_v23 }
 0xb97   :  { %1102 = vtanh.f32 %v566_v26 }
 0xba2   :  { %v1101_v25 = vpop.eup %1100 }
 0xba3   :  { %573 = vrot.lane.b32.xlu1 %v1101_v25, %s1128_s18 }
 0xba4   :  { %v1103_v27 = vpop.eup %1102 }
 0xba5   :  { %v568_v28 = vmul.f32 0.5, %v1103_v27 }
 0xba7   :  { %v569_v29 = vadd.f32 0.5, %v568_v28 }
 0xba9   :  { %v571_v32 = vmul.f32 %v569_v29, %v478_v16 }
 0xc15   :  { %v574_v30 = vpop.permute.xlu1 %573 }
 0xc16   :  { %v576_v31 = vmul.f32 %v574_v30, %v569_v29 }
 0xc18   :  { %578 = vrot.lane.b32.xlu0 %v576_v31, %s1129_s19 }
 0xc8a   :  { %v579_v33 = vpop.permute.xlu0 %578 }
 0xc8b   :  { %v581_v34 = vadd.f32 %v579_v33, %v571_v32 }
 0xc8d   :  { %1104 = vtanh.f32 %v581_v34 }
 0xc9a   :  { %v1105_v35 = vpop.eup %1104 }
 0xc9b   :  { %584 = vrot.lane.b32.xlu1 %v1105_v35, %s1128_s18 }
 0xd0d   :  { %v585_v36 = vpop.permute.xlu1 %584 }
 0xd0e   :  { %v587_v37 = vmul.f32 %v585_v36, %v569_v29 }
 0xd10   :  { %589 = vrot.lane.b32.xlu0 %v587_v37, %s1129_s19 }
 0xd82   :  { %v590_v38 = vpop.permute.xlu0 %589 }
 0xd83   :  { %933 = vst.msk [vmem:[%s1351_s2 + $0x8] sm:$0x3] %vm65_vm0, %v590_v38  ;;  %1047 = vmatmul.mubr.msk.f32.vlgmr.msra.gmra.mxu1 %vm75_vm2, %v590_v38 }
 0xd84   :  { %1061 = vmatpush3.msra.mxu1 %v1164_v3  ;;  %1068 = vmatprep.mubr.msk.f32.mxu1 %vm1127_vm1, %v1126_v4 }
 0xd85   :  { %1062 = vmatprep.subr.mxu1 %v1126_v4 }
 0xd86   :  { %1063 = vmatpush3.msra.mxu1 %v1159_v2 }
 0xd87   :  { %1064 = vmatprep.subr.mxu1 %v1126_v4 }
 0xd88   :  { %1065 = vmatpush3.msra.mxu1 %v1154_v1 }
 0xd89   :  { %1066 = vmatprep.subr.mxu1 %v1126_v4 }
 0xd8a   :  { %1067 = vmatpush3.msra.mxu1 %v1149_v0 }
 0xe43   :  { %v664_v3 = vpop.f32.mrf.mxu1 }
 0xe44   :  { %v668_v40 = vadd.f32 %v934_v39, %v664_v3 }
 0xe45   :  { %v1048_v41 = vpop.f32.mrf.mxu1 }
 0xe46   :  { %1106 = vtanh.f32 %v668_v40  ;;  %v669_v2 = vmul.f32 0.5, %v668_v40 }
 0xe48   :  { %1108 = vtanh.f32 %v669_v2 }
 0xe53   :  { %v1107_v42 = vpop.eup %1106 }
 0xe54   :  { %676 = vrot.lane.b32.xlu1 %v1107_v42, %s1128_s18 }
 0xe55   :  { %v1109_v43 = vpop.eup %1108 }
 0xe56   :  { %v671_v44 = vmul.f32 0.5, %v1109_v43 }
 0xe58   :  { %v672_v1 = vadd.f32 0.5, %v671_v44 }
 0xe5a   :  { %v674_v0 = vmul.f32 %v672_v1, %v581_v34 }
 0xec6   :  { %v677_v45 = vpop.permute.xlu1 %676 }
 0xec7   :  { %v679_v4 = vmul.f32 %v677_v45, %v672_v1 }
 0xec9   :  { %681 = vrot.lane.b32.xlu0 %v679_v4, %s1129_s19 }
 0xf3b   :  { %v682_v46 = vpop.permute.xlu0 %681 }
 0xf3c   :  { %v684_v47 = vadd.f32 %v682_v46, %v674_v0 }
 0xf3e   :  { %1110 = vtanh.f32 %v684_v47 }
 0xf4b   :  { %v1111_v48 = vpop.eup %1110 }
 0xf4c   :  { %687 = vrot.lane.b32.xlu1 %v1111_v48, %s1128_s18 }
 0xfbe   :  { %v688_v49 = vpop.permute.xlu1 %687 }
 0xfbf   :  { %v690_v50 = vmul.f32 %v688_v49, %v672_v1 }
 0xfc1   :  { %692 = vrot.lane.b32.xlu0 %v690_v50, %s1129_s19 }
0x1033   :  { %v693_v51 = vpop.permute.xlu0 %692 }
0x1034   :  { %936 = vst.msk [vmem:[%s1351_s2 + $0xa] sm:$0x3] %vm65_vm0, %v693_v51  ;;  %1058 = vmatmul.mubr.msk.f32.vlgmr.msra.gmra.mxu0 %vm75_vm2, %v693_v51 }
0x10f4   :  { %v767_v53 = vpop.f32.mrf.mxu0 }
0x10f5   :  { %v771_v54 = vadd.f32 %v937_v52, %v767_v53 }
0x10f6   :  { %v1059_v55 = vpop.f32.mrf.mxu0 }
0x10f7   :  { %1112 = vtanh.f32 %v771_v54  ;;  %v772_v57 = vmul.f32 0.5, %v771_v54 }
0x10f9   :  { %1114 = vtanh.f32 %v772_v57 }
0x1104   :  { %v1113_v56 = vpop.eup %1112 }
0x1105   :  { %779 = vrot.lane.b32.xlu1 %v1113_v56, %s1128_s18 }
0x1106   :  { %v1115_v58 = vpop.eup %1114 }
0x1107   :  { %v774_v59 = vmul.f32 0.5, %v1115_v58 }
0x1109   :  { %v775_v60 = vadd.f32 0.5, %v774_v59 }
0x110b   :  { %v777_v63 = vmul.f32 %v775_v60, %v684_v47 }
0x1177   :  { %v780_v61 = vpop.permute.xlu1 %779 }
0x1178   :  { %v782_v62 = vmul.f32 %v780_v61, %v775_v60 }
0x117a   :  { %784 = vrot.lane.b32.xlu0 %v782_v62, %s1129_s19 }
0x11ec   :  { %v785_v5 = vpop.permute.xlu0 %784 }
0x11ed   :  { %v787_v6 = vadd.f32 %v785_v5, %v777_v63 }
0x11ef   :  { %1116 = vtanh.f32 %v787_v6 }
0x11fc   :  { %v1117_v7 = vpop.eup %1116 }
0x11fd   :  { %790 = vrot.lane.b32.xlu1 %v1117_v7, %s1128_s18 }
0x126f   :  { %v791_v8 = vpop.permute.xlu1 %790 }
0x1270   :  { %v793_v9 = vmul.f32 %v791_v8, %v775_v60 }
0x1272   :  { %795 = vrot.lane.b32.xlu0 %v793_v9, %s1129_s19 }
0x12e4   :  { %v796_v10 = vpop.permute.xlu0 %795 }
0x12e5   :  { %939 = vst.msk [vmem:[%s1351_s2 + $0xc] sm:$0x3] %vm65_vm0, %v796_v10  ;;  %1069 = vmatmul.mubr.msk.f32.vlgmr.msra.gmra.mxu1 %vm75_vm2, %v796_v10 }
0x13a5   :  { %v870_v12 = vpop.f32.mrf.mxu1 }
0x13a6   :  { %v874_v13 = vadd.f32 %v940_v11, %v870_v12 }
0x13a7   :  { %v1070_v14 = vpop.f32.mrf.mxu1 }
0x13a8   :  { %1118 = vtanh.f32 %v874_v13  ;;  %v875_v16 = vmul.f32 0.5, %v874_v13 }
0x13aa   :  { %1120 = vtanh.f32 %v875_v16 }
0x13b5   :  { %v1119_v15 = vpop.eup %1118 }
0x13b6   :  { %882 = vrot.lane.b32.xlu1 %v1119_v15, %s1128_s18 }
0x13b7   :  { %v1121_v17 = vpop.eup %1120 }
0x13b8   :  { %v877_v18 = vmul.f32 0.5, %v1121_v17 }
0x13ba   :  { %v878_v19 = vadd.f32 0.5, %v877_v18 }
0x13bc   :  { %v880_v22 = vmul.f32 %v878_v19, %v787_v6 }
0x1428   :  { %v883_v20 = vpop.permute.xlu1 %882 }
0x1429   :  { %v885_v21 = vmul.f32 %v883_v20, %v878_v19 }
0x142b   :  { %887 = vrot.lane.b32.xlu0 %v885_v21, %s1129_s19 }
0x149d   :  { %v888_v23 = vpop.permute.xlu0 %887 }
0x149e   :  { %v890_v24 = vadd.f32 %v888_v23, %v880_v22 }
0x14a0   :  { %1122 = vtanh.f32 %v890_v24 }
0x14ad   :  { %v1123_v25 = vpop.eup %1122 }
0x14ae   :  { %893 = vrot.lane.b32.xlu1 %v1123_v25, %s1128_s18 }
0x14b2   :  { %905 = vrot.lane.b32.xlu1 %v890_v24, %s1130_s0 }
0x1520   :  { %v894_v26 = vpop.permute.xlu1 %893 }
0x1521   :  { %v896_v27 = vmul.f32 %v894_v26, %v878_v19 }
0x1523   :  { %898 = vrot.lane.b32.xlu0 %v896_v27, %s1129_s19 }
0x1524   :  { %v906_v28 = vpop.permute.xlu1 %905 }
0x1525   :  { %908 = vst.msk [vmem:[#allocation4] sm:$0x3] %vm65_vm0, %v906_v28 }
0x1595   :  { %v899_v29 = vpop.permute.xlu0 %898 }
0x1596   :  { %942 = vst.msk [vmem:[%s1351_s2 + $0xe] sm:$0x3] %vm65_vm0, %v899_v29  ;;  %903 = vst.msk [vmem:[#allocation3] sm:$0x3] %vm65_vm0, %v899_v29 }

</bundles_post_ra>
